<compile_context>
chip_gen: v7x
topology: tpu7x:2x2x1
jax: 0.10.0
libtpu: 0.0.40
codegen_flags: <defaults>
</compile_context>

<pallas_src>
import math

import jax
import jax.numpy as jnp
import numpy as np
from jax.experimental import pallas as pl
from jax.experimental.pallas import tpu as pltpu

INV_SQRT2 = 1.0 / math.sqrt(2.0)
HIDDEN_IN = 1024   # nn.Linear(1024, 256)
HIDDEN_OUT = 256


def _gelu(x):
    # exact (erf-based) GELU == torch.nn.GELU() default
    return 0.5 * x * (1.0 + jax.lax.erf(x * INV_SQRT2))


def _residue_encoder_kernel(x_ref, m_ref, w_ref, b_ref, o_ref):
    # x: (TM, H)   m: (TM, 1)   w: (H, D)   b: (1, D)   o: (TM, D)
    y = jnp.dot(x_ref[...], w_ref[...], preferred_element_type=jnp.float32)
    y = (y + b_ref[...]) * m_ref[...]          # mask BEFORE activation (as in torch)
    o_ref[...] = _gelu(y).astype(o_ref.dtype)


def _round_up(x, m):
    return -(-x // m) * m


def residue_encoder_forward(prot_feat, prot_mask, w, b, *, tile_m=256):
    """prot_feat: (B, L, H) f32, prot_mask: (B, L) f32, w: (H, D), b: (D,)."""
    B, L, H = prot_feat.shape
    D = w.shape[1]
    N = B * L

    # Fold batch into the row/sublane axis (the op is purely row-wise).
    x = prot_feat.reshape(N, H)
    m = prot_mask.reshape(N, 1).astype(prot_feat.dtype)
    b2 = b.reshape(1, D)

    # Row tile: at most `tile_m`, at least sublane-aligned; pad rows so every
    # block is full (padded rows are masked to zero and sliced off below).
    tm = min(tile_m, _round_up(N, 8))
    n_pad = _round_up(N, tm)
    if n_pad != N:
        x = jnp.pad(x, ((0, n_pad - N), (0, 0)))
        m = jnp.pad(m, ((0, n_pad - N), (0, 0)))

    out = pl.pallas_call(
        _residue_encoder_kernel,
        out_shape=jax.ShapeDtypeStruct((n_pad, D), prot_feat.dtype),
        grid=(n_pad // tm,),
        in_specs=[
            pl.BlockSpec((tm, H), lambda i: (i, 0)),   # features
            pl.BlockSpec((tm, 1), lambda i: (i, 0)),   # mask (column)
            pl.BlockSpec((H, D), lambda i: (0, 0)),    # weight (resident)
            pl.BlockSpec((1, D), lambda i: (0, 0)),    # bias   (resident)
        ],
        out_specs=pl.BlockSpec((tm, D), lambda i: (i, 0)),
        compiler_params=pltpu.CompilerParams(
            dimension_semantics=("parallel",)),
    )(x, m, w, b2)

    return out[:N].reshape(B, L, D)


def reference_forward(prot_feat, prot_mask, w, b):
    """Plain-JAX transcription of the PyTorch forward (dropout = identity)."""
    y = prot_feat @ w + b.reshape(1, 1, -1)
    y = y * prot_mask[:, :, None]
    return _gelu(y)


if __name__ == "__main__":
    B, L = 2, 8                       # batch, sequence length
    H, D = HIDDEN_IN, HIDDEN_OUT      # fixed by the module: Linear(1024, 256)

    key = jax.random.PRNGKey(0)
    k_feat, k_w, k_b = jax.random.split(key, 3)

    prot_feat = jax.random.normal(k_feat, (B, L, H), dtype=jnp.float32)

    # deterministic binary masks (valid lengths per batch element)
    lens = jnp.array([8, 5])
    prot_mask = (jnp.arange(L)[None, :] < lens[:, None]).astype(jnp.float32)

    # Linear(1024, 256) params, PyTorch-style uniform(-1/sqrt(H), 1/sqrt(H)) init
    bound = 1.0 / math.sqrt(H)
    w = jax.random.uniform(k_w, (H, D), jnp.float32, -bound, bound)
    b = jax.random.uniform(k_b, (D,), jnp.float32, -bound, bound)

    out = residue_encoder_forward(prot_feat, prot_mask, w, b)
    out = jax.block_until_ready(out)

    ref = reference_forward(prot_feat, prot_mask, w, b)
    np.testing.assert_allclose(np.asarray(out), np.asarray(ref),
                               rtol=2e-3, atol=2e-3)

    print("KERNEL_OK")
</pallas_src>

<mosaic_0001>
module attributes {stable_mosaic.version = 11 : i64} {
  func.func @_residue_encoder_kernel(%arg0: i32, %arg1: memref<16x1024xf32, #tpu.memory_space<vmem>>, %arg2: memref<16x1xf32, #tpu.memory_space<vmem>>, %arg3: memref<1024x256xf32, #tpu.memory_space<vmem>>, %arg4: memref<1x256xf32, #tpu.memory_space<vmem>>, %arg5: memref<16x256xf32, #tpu.memory_space<vmem>>) attributes {dimension_semantics = [#tpu.dimension_semantics<parallel>], iteration_bounds = array<i64: 1>, scalar_prefetch = 0 : i64, scratch_operands = 0 : i64, tpu.core_type = #tpu.core_type<tc>, window_params = [{transform_indices = @transform_0, window_bounds = array<i64: 16, 1024>}, {transform_indices = @transform_1, window_bounds = array<i64: 16, 1>}, {pipeline_mode = #tpu.pipeline_mode<synchronous>, transform_indices = @transform_2, window_bounds = array<i64: 1024, 256>}, {pipeline_mode = #tpu.pipeline_mode<synchronous>, transform_indices = @transform_3, window_bounds = array<i64: 1, 256>}, {transform_indices = @transform_4, window_bounds = array<i64: 16, 256>}]} {
    %c0 = arith.constant 0 : index
    %c0_0 = arith.constant 0 : index
    %0 = vector.load %arg1[%c0, %c0_0] : memref<16x1024xf32, #tpu.memory_space<vmem>>, vector<16x1024xf32>
    %c0_1 = arith.constant 0 : index
    %c0_2 = arith.constant 0 : index
    %1 = vector.load %arg3[%c0_1, %c0_2] : memref<1024x256xf32, #tpu.memory_space<vmem>>, vector<1024x256xf32>
    %cst = arith.constant dense<0.000000e+00> : vector<16x256xf32>
    %2 = tpu.matmul %0, %1, %cst {dimension_numbers = #tpu.dot_dimension_numbers<[1], [0], [0], [1], [0, 0, 1, 1], [], []>} : vector<16x1024xf32>, vector<1024x256xf32>, vector<16x256xf32> -> vector<16x256xf32>
    %c0_3 = arith.constant 0 : index
    %c0_4 = arith.constant 0 : index
    %3 = vector.load %arg4[%c0_3, %c0_4] : memref<1x256xf32, #tpu.memory_space<vmem>>, vector<1x256xf32>
    %4 = vector.broadcast %3 : vector<1x256xf32> to vector<16x256xf32>
    %5 = arith.addf %2, %4 : vector<16x256xf32>
    %c0_5 = arith.constant 0 : index
    %c0_6 = arith.constant 0 : index
    %6 = vector.load %arg2[%c0_5, %c0_6] : memref<16x1xf32, #tpu.memory_space<vmem>>, vector<16x1xf32>
    %7 = vector.broadcast %6 : vector<16x1xf32> to vector<16x256xf32>
    %8 = arith.mulf %5, %7 : vector<16x256xf32>
    %cst_7 = arith.constant 5.000000e-01 : f32
    %9 = vector.broadcast %cst_7 : f32 to vector<16x256xf32>
    %10 = arith.mulf %9, %8 : vector<16x256xf32>
    %cst_8 = arith.constant 0.707106769 : f32
    %11 = vector.broadcast %cst_8 : f32 to vector<16x256xf32>
    %12 = arith.mulf %8, %11 : vector<16x256xf32>
    %13 = math.erf %12 : vector<16x256xf32>
    %cst_9 = arith.constant 1.000000e+00 : f32
    %14 = vector.broadcast %cst_9 : f32 to vector<16x256xf32>
    %15 = arith.addf %14, %13 : vector<16x256xf32>
    %16 = arith.mulf %10, %15 : vector<16x256xf32>
    %c0_10 = arith.constant 0 : index
    %c0_11 = arith.constant 0 : index
    %17 = vector.load %arg5[%c0_10, %c0_11] : memref<16x256xf32, #tpu.memory_space<vmem>>, vector<16x256xf32>
    tpu.vector_store %arg5[%c0_10, %c0_11], %16 {strides = array<i32>} : memref<16x256xf32, #tpu.memory_space<vmem>>, vector<16x256xf32>,
    return
  }
  func.func @transform_0(%arg0: i32) -> (i32, i32) {
    %c0_i32 = arith.constant 0 : i32
    %c0_i32_0 = arith.constant 0 : i32
    return %arg0, %c0_i32 : i32, i32
  }
  func.func @transform_1(%arg0: i32) -> (i32, i32) {
    %c0_i32 = arith.constant 0 : i32
    %c0_i32_0 = arith.constant 0 : i32
    return %arg0, %c0_i32 : i32, i32
  }
  func.func @transform_2(%arg0: i32) -> (i32, i32) {
    %c0_i32 = arith.constant 0 : i32
    %c0_i32_0 = arith.constant 0 : i32
    %c0_i32_1 = arith.constant 0 : i32
    return %c0_i32, %c0_i32_0 : i32, i32
  }
  func.func @transform_3(%arg0: i32) -> (i32, i32) {
    %c0_i32 = arith.constant 0 : i32
    %c0_i32_0 = arith.constant 0 : i32
    %c0_i32_1 = arith.constant 0 : i32
    return %c0_i32, %c0_i32_0 : i32, i32
  }
  func.func @transform_4(%arg0: i32) -> (i32, i32) {
    %c0_i32 = arith.constant 0 : i32
    %c0_i32_0 = arith.constant 0 : i32
    return %arg0, %c0_i32 : i32, i32
  }
}

</mosaic_0001>

<bundles_post_ra>
// kernel: tpu_custom_call.1
= control target key start
LH: loop header
LB: loop body
LE: loop exit
PB: predicated region body
PF: predicated region fallthrough
CT: control target
= control target key end

     0   :  { %9 = vsyncpa [#allocation3], 0  ;;  %s1141_s0 = inlined_call_operand.hbm [shape: f32[16,1024], index: 0, kind: input, shape index: {}]   ;;  %s1142_s1 = inlined_call_operand.vmem [shape: f32[16,1], index: 1, kind: input, shape index: {}]   ;;  %s1143_s2 = inlined_call_operand.hbm [shape: f32[1024,256], index: 2, kind: input, shape index: {}]   ;;  %s1144_s3 = inlined_call_operand.vmem [shape: f32[1,256], index: 3, kind: input, shape index: {}]   ;;  %s1145_s4 = inlined_call_operand.hbm [shape: f32[16,256], index: 4, kind: output, shape index: {}]  }
   0x1   :  { %10 = vsyncpa [#allocation6], 0 }
   0x2   :  { %11 = vsyncpa [#allocation4], 0  ;;  %s1057_s15 = smov [#allocation2]   ;;  %s985_s19 = scalar_lea.hbm %s1141_s0, 2048 }
   0x3   :  { %s17_s16 = sshll.u32 %s1057_s15, 4  ;;  %p986_p0 = scmp.ne.s32.totalorder %s1141_s0, %s985_s19  ;;  %s18_s16 = int_to_ptr.vmem [resolvable:$true] %s17_s16 }
   0x4   :  { %p989_p1 = scmp.lt.u32.totalorder %s985_s19, %s1141_s0 }
   0x6   :  { %p991_p2 = pnand %p989_p1, %p986_p0 }
   0x8   :  { %994 = shalt.err (!%p991_p2)
}
   0x9   :  { %s995_s24 = scalar_lea.vmem %s18_s16, 2048  ;;  %p1000_p4 = scmp.lt.s32.totalorder %s18_s16, %s18_s16 }
   0xa   :  { %p996_p3 = scmp.ne.s32.totalorder %s18_s16, %s995_s24  ;;  %p1001_p5 = scmp.lt.s32.totalorder %s995_s24, %s995_s24 }
   0xc   :  { %p1002_p6 = por %p1001_p5, %p1000_p4 }
   0xe   :  { %p1003_p7 = pnand %p1002_p6, %p996_p3 }
  0x10   :  { %1006 = shalt.err (!%p1003_p7)
}
  0x11   :  { %s1058_s25 = smov 1024   ;;  %s1059_s26 = smov 64  }
  0x12   :  { %23 = dma.hbm_to_vmem [thread:$0]  %s1141_s0, 2048, %s18_s16, [#allocation3], %s1058_s25, %s1058_s25, %s1059_s26  }
  0x13   :  { %s1060_s29 = smov [#allocation5]   ;;  %s1007_s7 = scalar_lea.hbm %s1143_s2, 32768 }
  0x14   :  { %s31_s30 = sshll.u32 %s1060_s29, 4  ;;  %p1008_p8 = scmp.ne.s32.totalorder %s1143_s2, %s1007_s7  ;;  %s32_s30 = int_to_ptr.vmem [resolvable:$true] %s31_s30 }
  0x15   :  { %p1011_p9 = scmp.lt.u32.totalorder %s1007_s7, %s1143_s2 }
  0x17   :  { %p1013_p10 = pnand %p1011_p9, %p1008_p8 }
  0x19   :  { %1016 = shalt.err (!%p1013_p10)
}
  0x1a   :  { %s1017_s12 = scalar_lea.vmem %s32_s30, 32768  ;;  %p1022_p12 = scmp.lt.s32.totalorder %s32_s30, %s32_s30 }
  0x1b   :  { %p1018_p11 = scmp.ne.s32.totalorder %s32_s30, %s1017_s12  ;;  %p1023_p13 = scmp.lt.s32.totalorder %s1017_s12, %s1017_s12 }
  0x1d   :  { %p1024_p0 = por %p1023_p13, %p1022_p12 }
  0x1f   :  { %p1025_p1 = pnand %p1024_p0, %p1018_p11 }
  0x21   :  { %1028 = shalt.err (!%p1025_p1)
}
  0x22   :  { %s1061_s0 = smov 256   ;;  %s1062_s13 = smov 16  }
  0x23   :  { %37 = dma.hbm_to_vmem [thread:$0]  %s1143_s2, 32768, %s32_s30, [#allocation6], %s1061_s0, %s1061_s0, %s1062_s13  }
  0x24   :  { %1051 = dma.done.wait [#allocation3], 2048  }
  0x25   :  { %1052 = vsyncadd [#allocation3], 4294965248 }
  0x26   :  { %1053 = dma.done.wait [#allocation6], 32768  }
  0x27   :  { %1054 = vsyncadd [#allocation6], 4294934528  ;;  %v63_v0 = vld [vmem:[#allocation5 + $0x8] sm:$0xff]  ;;  %v65_v1 = vld [vmem:[#allocation5 + $0x18] sm:$0xff]  ;;  %v1063_v47 = vmov 0  }
  0x28   :  { %v191_v2 = vld [vmem:[#allocation5 + $0x408] sm:$0xff]  ;;  %v696_v3 = vpack.c.bf16 %v65_v1, %v63_v0  ;;  %v193_v4 = vld [vmem:[#allocation5 + $0x418] sm:$0xff]  ;;  %v62_v5 = vld [vmem:[#allocation5] sm:$0xff]  ;;  %976 = vset.pattern.permute.xlu0 %v1063_v47 }
  0x29   :  { %v64_v6 = vld [vmem:[#allocation5 + $0x10] sm:$0xff]  ;;  %v824_v7 = vpack.c.bf16 %v193_v4, %v191_v2  ;;  %v190_v9 = vld [vmem:[#allocation5 + $0x400] sm:$0xff]  ;;  %v67_v11 = vld [vmem:[#allocation5 + $0x28] sm:$0xff] }
  0x2a   :  { %v698_v8 = vpack.c.bf16 %v64_v6, %v62_v5  ;;  %v192_v10 = vld [vmem:[#allocation5 + $0x410] sm:$0xff]  ;;  %697 = vmatprep.subr.bf16.mxu1 %v696_v3  ;;  %v69_v13 = vld [vmem:[#allocation5 + $0x38] sm:$0xff]  ;;  %v195_v14 = vld [vmem:[#allocation5 + $0x428] sm:$0xff] }
  0x2b   :  { %v826_v12 = vpack.c.bf16 %v192_v10, %v190_v9  ;;  %v197_v15 = vld [vmem:[#allocation5 + $0x438] sm:$0xff]  ;;  %825 = vmatprep.subr.bf16.mxu0 %v824_v7  ;;  %v700_v16 = vpack.c.bf16 %v69_v13, %v67_v11  ;;  %v66_v18 = vld [vmem:[#allocation5 + $0x20] sm:$0xff]  ;;  %v68_v19 = vld [vmem:[#allocation5 + $0x30] sm:$0xff] }
  0x2c   :  { %699 = vmatpush1.bf16.msra.mxu1 %v698_v8  ;;  %v828_v17 = vpack.c.bf16 %v197_v15, %v195_v14  ;;  %v194_v20 = vld [vmem:[#allocation5 + $0x420] sm:$0xff]  ;;  %v702_v21 = vpack.c.bf16 %v68_v19, %v66_v18  ;;  %v196_v22 = vld [vmem:[#allocation5 + $0x430] sm:$0xff]  ;;  %v71_v23 = vld [vmem:[#allocation5 + $0x48] sm:$0xff] }
  0x2d   :  { %827 = vmatpush1.bf16.msra.mxu0 %v826_v12  ;;  %v73_v24 = vld [vmem:[#allocation5 + $0x58] sm:$0xff]  ;;  %701 = vmatprep.subr.bf16.mxu1 %v700_v16  ;;  %v830_v25 = vpack.c.bf16 %v196_v22, %v194_v20  ;;  %v199_v27 = vld [vmem:[#allocation5 + $0x448] sm:$0xff]  ;;  %v70_v29 = vld [vmem:[#allocation5 + $0x40] sm:$0xff] }
  0x2e   :  { %829 = vmatprep.subr.bf16.mxu0 %v828_v17  ;;  %v704_v26 = vpack.c.bf16 %v73_v24, %v71_v23  ;;  %v201_v28 = vld [vmem:[#allocation5 + $0x458] sm:$0xff]  ;;  %v72_v31 = vld [vmem:[#allocation5 + $0x50] sm:$0xff]  ;;  %v198_v32 = vld [vmem:[#allocation5 + $0x440] sm:$0xff] }
  0x2f   :  { %v832_v30 = vpack.c.bf16 %v201_v28, %v199_v27  ;;  %v200_v33 = vld [vmem:[#allocation5 + $0x450] sm:$0xff]  ;;  %v706_v34 = vpack.c.bf16 %v72_v31, %v70_v29  ;;  %v75_v35 = vld [vmem:[#allocation5 + $0x68] sm:$0xff]  ;;  %v77_v36 = vld [vmem:[#allocation5 + $0x78] sm:$0xff] }
  0x30   :  { %703 = vmatpush1.bf16.msra.mxu1 %v702_v21  ;;  %v203_v37 = vld [vmem:[#allocation5 + $0x468] sm:$0xff]  ;;  %v834_v38 = vpack.c.bf16 %v200_v33, %v198_v32  ;;  %v708_v39 = vpack.c.bf16 %v77_v36, %v75_v35  ;;  %v205_v40 = vld [vmem:[#allocation5 + $0x478] sm:$0xff]  ;;  %v74_v41 = vld [vmem:[#allocation5 + $0x60] sm:$0xff] }
  0x31   :  { %831 = vmatpush1.bf16.msra.mxu0 %v830_v25  ;;  %705 = vmatprep.subr.bf16.mxu1 %v704_v26  ;;  %v76_v42 = vld [vmem:[#allocation5 + $0x70] sm:$0xff]  ;;  %v836_v43 = vpack.c.bf16 %v205_v40, %v203_v37  ;;  %v202_v44 = vld [vmem:[#allocation5 + $0x460] sm:$0xff]  ;;  %v79_v46 = vld [vmem:[#allocation5 + $0x88] sm:$0xff] }
  0x32   :  { %833 = vmatprep.subr.bf16.mxu0 %v832_v30  ;;  %v204_v45 = vld [vmem:[#allocation5 + $0x470] sm:$0xff]  ;;  %v81_v48 = vld [vmem:[#allocation5 + $0x98] sm:$0xff]  ;;  %v207_v49 = vld [vmem:[#allocation5 + $0x488] sm:$0xff]  ;;  %v710_v51 = vpack.c.bf16 %v76_v42, %v74_v41 }
  0x33   :  { %v209_v50 = vld [vmem:[#allocation5 + $0x498] sm:$0xff]  ;;  %v838_v52 = vpack.c.bf16 %v204_v45, %v202_v44  ;;  %v712_v53 = vpack.c.bf16 %v81_v48, %v79_v46  ;;  %v78_v54 = vld [vmem:[#allocation5 + $0x80] sm:$0xff]  ;;  %v80_v55 = vld [vmem:[#allocation5 + $0x90] sm:$0xff] }
  0x34   :  { %707 = vmatpush1.bf16.msra.mxu1 %v706_v34  ;;  %v206_v56 = vld [vmem:[#allocation5 + $0x480] sm:$0xff]  ;;  %v840_v57 = vpack.c.bf16 %v209_v50, %v207_v49  ;;  %v208_v58 = vld [vmem:[#allocation5 + $0x490] sm:$0xff]  ;;  %v83_v59 = vld [vmem:[#allocation5 + $0xa8] sm:$0xff]  ;;  %v714_v63 = vpack.c.bf16 %v80_v55, %v78_v54 }
  0x35   :  { %835 = vmatpush1.bf16.msra.mxu0 %v834_v38  ;;  %709 = vmatprep.subr.bf16.mxu1 %v708_v39  ;;  %v85_v60 = vld [vmem:[#allocation5 + $0xb8] sm:$0xff]  ;;  %v211_v61 = vld [vmem:[#allocation5 + $0x4a8] sm:$0xff]  ;;  %v842_v0 = vpack.c.bf16 %v208_v58, %v206_v56  ;;  %v82_v2 = vld [vmem:[#allocation5 + $0xa0] sm:$0xff] }
  0x36   :  { %837 = vmatprep.subr.bf16.mxu0 %v836_v43  ;;  %v213_v62 = vld [vmem:[#allocation5 + $0x4b8] sm:$0xff]  ;;  %v716_v1 = vpack.c.bf16 %v85_v60, %v83_v59  ;;  %v84_v3 = vld [vmem:[#allocation5 + $0xb0] sm:$0xff]  ;;  %v210_v4 = vld [vmem:[#allocation5 + $0x4a0] sm:$0xff] }
  0x37   :  { %v844_v5 = vpack.c.bf16 %v213_v62, %v211_v61  ;;  %v212_v6 = vld [vmem:[#allocation5 + $0x4b0] sm:$0xff]  ;;  %v87_v7 = vld [vmem:[#allocation5 + $0xc8] sm:$0xff]  ;;  %v89_v8 = vld [vmem:[#allocation5 + $0xd8] sm:$0xff]  ;;  %v718_v11 = vpack.c.bf16 %v84_v3, %v82_v2 }
  0x38   :  { %711 = vmatpush1.bf16.msra.mxu1 %v710_v51  ;;  %v215_v9 = vld [vmem:[#allocation5 + $0x4c8] sm:$0xff]  ;;  %v217_v10 = vld [vmem:[#allocation5 + $0x4d8] sm:$0xff]  ;;  %v846_v12 = vpack.c.bf16 %v212_v6, %v210_v4  ;;  %v720_v13 = vpack.c.bf16 %v89_v8, %v87_v7  ;;  %v86_v14 = vld [vmem:[#allocation5 + $0xc0] sm:$0xff] }
  0x39   :  { %839 = vmatpush1.bf16.msra.mxu0 %v838_v52  ;;  %713 = vmatprep.subr.bf16.mxu1 %v712_v53  ;;  %v88_v15 = vld [vmem:[#allocation5 + $0xd0] sm:$0xff]  ;;  %v214_v16 = vld [vmem:[#allocation5 + $0x4c0] sm:$0xff]  ;;  %v848_v17 = vpack.c.bf16 %v217_v10, %v215_v9  ;;  %v91_v19 = vld [vmem:[#allocation5 + $0xe8] sm:$0xff] }
  0x3a   :  { %841 = vmatprep.subr.bf16.mxu0 %v840_v57  ;;  %v216_v18 = vld [vmem:[#allocation5 + $0x4d0] sm:$0xff]  ;;  %v93_v20 = vld [vmem:[#allocation5 + $0xf8] sm:$0xff]  ;;  %v219_v21 = vld [vmem:[#allocation5 + $0x4e8] sm:$0xff]  ;;  %v722_v23 = vpack.c.bf16 %v88_v15, %v86_v14 }
  0x3b   :  { %v221_v22 = vld [vmem:[#allocation5 + $0x4f8] sm:$0xff]  ;;  %v850_v24 = vpack.c.bf16 %v216_v18, %v214_v16  ;;  %v724_v25 = vpack.c.bf16 %v93_v20, %v91_v19  ;;  %v90_v26 = vld [vmem:[#allocation5 + $0xe0] sm:$0xff]  ;;  %v92_v27 = vld [vmem:[#allocation5 + $0xf0] sm:$0xff] }
  0x3c   :  { %715 = vmatpush1.bf16.msra.mxu1 %v714_v63  ;;  %v218_v28 = vld [vmem:[#allocation5 + $0x4e0] sm:$0xff]  ;;  %v852_v29 = vpack.c.bf16 %v221_v22, %v219_v21  ;;  %v220_v30 = vld [vmem:[#allocation5 + $0x4f0] sm:$0xff]  ;;  %v95_v31 = vld [vmem:[#allocation5 + $0x108] sm:$0xff]  ;;  %v726_v35 = vpack.c.bf16 %v92_v27, %v90_v26 }
  0x3d   :  { %843 = vmatpush1.bf16.msra.mxu0 %v842_v0  ;;  %717 = vmatprep.subr.bf16.mxu1 %v716_v1  ;;  %v97_v32 = vld [vmem:[#allocation5 + $0x118] sm:$0xff]  ;;  %v223_v33 = vld [vmem:[#allocation5 + $0x508] sm:$0xff]  ;;  %v854_v36 = vpack.c.bf16 %v220_v30, %v218_v28  ;;  %v94_v38 = vld [vmem:[#allocation5 + $0x100] sm:$0xff] }
  0x3e   :  { %845 = vmatprep.subr.bf16.mxu0 %v844_v5  ;;  %v225_v34 = vld [vmem:[#allocation5 + $0x518] sm:$0xff]  ;;  %v728_v37 = vpack.c.bf16 %v97_v32, %v95_v31  ;;  %v96_v39 = vld [vmem:[#allocation5 + $0x110] sm:$0xff]  ;;  %v222_v40 = vld [vmem:[#allocation5 + $0x500] sm:$0xff] }
  0x3f   :  { %v856_v41 = vpack.c.bf16 %v225_v34, %v223_v33  ;;  %v224_v42 = vld [vmem:[#allocation5 + $0x510] sm:$0xff]  ;;  %v99_v43 = vld [vmem:[#allocation5 + $0x128] sm:$0xff]  ;;  %v101_v44 = vld [vmem:[#allocation5 + $0x138] sm:$0xff]  ;;  %v730_v47 = vpack.c.bf16 %v96_v39, %v94_v38 }
  0x40   :  { %719 = vmatpush1.bf16.msra.mxu1 %v718_v11  ;;  %v227_v45 = vld [vmem:[#allocation5 + $0x528] sm:$0xff]  ;;  %v229_v46 = vld [vmem:[#allocation5 + $0x538] sm:$0xff]  ;;  %v858_v48 = vpack.c.bf16 %v224_v42, %v222_v40  ;;  %v732_v49 = vpack.c.bf16 %v101_v44, %v99_v43  ;;  %v98_v50 = vld [vmem:[#allocation5 + $0x120] sm:$0xff] }
  0x41   :  { %847 = vmatpush1.bf16.msra.mxu0 %v846_v12  ;;  %721 = vmatprep.subr.bf16.mxu1 %v720_v13  ;;  %v100_v51 = vld [vmem:[#allocation5 + $0x130] sm:$0xff]  ;;  %v226_v52 = vld [vmem:[#allocation5 + $0x520] sm:$0xff]  ;;  %v860_v53 = vpack.c.bf16 %v229_v46, %v227_v45  ;;  %v103_v55 = vld [vmem:[#allocation5 + $0x148] sm:$0xff] }
  0x42   :  { %849 = vmatprep.subr.bf16.mxu0 %v848_v17  ;;  %v228_v54 = vld [vmem:[#allocation5 + $0x530] sm:$0xff]  ;;  %v105_v56 = vld [vmem:[#allocation5 + $0x158] sm:$0xff]  ;;  %v231_v57 = vld [vmem:[#allocation5 + $0x548] sm:$0xff]  ;;  %v734_v59 = vpack.c.bf16 %v100_v51, %v98_v50 }
  0x43   :  { %v233_v58 = vld [vmem:[#allocation5 + $0x558] sm:$0xff]  ;;  %v862_v60 = vpack.c.bf16 %v228_v54, %v226_v52  ;;  %v736_v61 = vpack.c.bf16 %v105_v56, %v103_v55  ;;  %v102_v62 = vld [vmem:[#allocation5 + $0x140] sm:$0xff]  ;;  %v104_v63 = vld [vmem:[#allocation5 + $0x150] sm:$0xff] }
  0x44   :  { %723 = vmatpush1.bf16.msra.mxu1 %v722_v23  ;;  %v230_v0 = vld [vmem:[#allocation5 + $0x540] sm:$0xff]  ;;  %v864_v1 = vpack.c.bf16 %v233_v58, %v231_v57  ;;  %v232_v2 = vld [vmem:[#allocation5 + $0x550] sm:$0xff]  ;;  %v107_v3 = vld [vmem:[#allocation5 + $0x168] sm:$0xff]  ;;  %v738_v7 = vpack.c.bf16 %v104_v63, %v102_v62 }
  0x45   :  { %851 = vmatpush1.bf16.msra.mxu0 %v850_v24  ;;  %725 = vmatprep.subr.bf16.mxu1 %v724_v25  ;;  %v109_v4 = vld [vmem:[#allocation5 + $0x178] sm:$0xff]  ;;  %v235_v5 = vld [vmem:[#allocation5 + $0x568] sm:$0xff]  ;;  %v106_v8 = vld [vmem:[#allocation5 + $0x160] sm:$0xff]  ;;  %v866_v9 = vpack.c.bf16 %v232_v2, %v230_v0 }
  0x46   :  { %853 = vmatprep.subr.bf16.mxu0 %v852_v29  ;;  %v237_v6 = vld [vmem:[#allocation5 + $0x578] sm:$0xff]  ;;  %v740_v10 = vpack.c.bf16 %v109_v4, %v107_v3  ;;  %v108_v11 = vld [vmem:[#allocation5 + $0x170] sm:$0xff]  ;;  %v234_v12 = vld [vmem:[#allocation5 + $0x560] sm:$0xff] }
  0x47   :  { %v236_v13 = vld [vmem:[#allocation5 + $0x570] sm:$0xff]  ;;  %v868_v14 = vpack.c.bf16 %v237_v6, %v235_v5  ;;  %v111_v15 = vld [vmem:[#allocation5 + $0x188] sm:$0xff]  ;;  %v113_v16 = vld [vmem:[#allocation5 + $0x198] sm:$0xff]  ;;  %v742_v21 = vpack.c.bf16 %v108_v11, %v106_v8 }
  0x48   :  { %727 = vmatpush1.bf16.msra.mxu1 %v726_v35  ;;  %v47_v17 = vld [vmem:[#allocation2 + $0x8] sm:$0xff]  ;;  %v241_v19 = vld [vmem:[#allocation5 + $0x598] sm:$0xff]  ;;  %v870_v22 = vpack.c.bf16 %v236_v13, %v234_v12  ;;  %v744_v23 = vpack.c.bf16 %v113_v16, %v111_v15  ;;  %v110_v24 = vld [vmem:[#allocation5 + $0x180] sm:$0xff] }
  0x49   :  { %855 = vmatpush1.bf16.msra.mxu0 %v854_v36  ;;  %729 = vmatprep.subr.bf16.mxu1 %v728_v37  ;;  %v239_v18 = vld [vmem:[#allocation5 + $0x588] sm:$0xff]  ;;  %v112_v25 = vld [vmem:[#allocation5 + $0x190] sm:$0xff]  ;;  %v238_v26 = vld [vmem:[#allocation5 + $0x580] sm:$0xff] }
  0x4a   :  { %857 = vmatprep.subr.bf16.mxu0 %v856_v41  ;;  %394 = vmatprep.mubr.f32.mxu1 %v47_v17  ;;  %v51_v20 = vld [vmem:[#allocation2 + $0x28] sm:$0xff]  ;;  %v872_v27 = vpack.c.bf16 %v241_v19, %v239_v18  ;;  %v240_v28 = vld [vmem:[#allocation5 + $0x590] sm:$0xff]  ;;  %v117_v30 = vld [vmem:[#allocation5 + $0x1b8] sm:$0xff]  ;;  %v746_v33 = vpack.c.bf16 %v112_v25, %v110_v24 }
  0x4b   :  { %548 = vmatprep.mubr.f32.mxu0 %v51_v20  ;;  %v115_v29 = vld [vmem:[#allocation5 + $0x1a8] sm:$0xff]  ;;  %v245_v32 = vld [vmem:[#allocation5 + $0x5b8] sm:$0xff]  ;;  %v874_v34 = vpack.c.bf16 %v240_v28, %v238_v26  ;;  %v114_v36 = vld [vmem:[#allocation5 + $0x1a0] sm:$0xff] }
  0x4c   :  { %731 = vmatpush1.bf16.msra.mxu1 %v730_v47  ;;  %v243_v31 = vld [vmem:[#allocation5 + $0x5a8] sm:$0xff]  ;;  %v748_v35 = vpack.c.bf16 %v117_v30, %v115_v29  ;;  %v116_v37 = vld [vmem:[#allocation5 + $0x1b0] sm:$0xff]  ;;  %v242_v38 = vld [vmem:[#allocation5 + $0x5a0] sm:$0xff] }
  0x4d   :  { %859 = vmatpush1.bf16.msra.mxu0 %v858_v48  ;;  %733 = vmatprep.subr.bf16.mxu1 %v732_v49  ;;  %v876_v39 = vpack.c.bf16 %v245_v32, %v243_v31  ;;  %v244_v40 = vld [vmem:[#allocation5 + $0x5b0] sm:$0xff]  ;;  %v119_v41 = vld [vmem:[#allocation5 + $0x1c8] sm:$0xff]  ;;  %v121_v42 = vld [vmem:[#allocation5 + $0x1d8] sm:$0xff]  ;;  %v750_v45 = vpack.c.bf16 %v116_v37, %v114_v36 }
  0x4e   :  { %861 = vmatprep.subr.bf16.mxu0 %v860_v53  ;;  %v247_v43 = vld [vmem:[#allocation5 + $0x5c8] sm:$0xff]  ;;  %v249_v44 = vld [vmem:[#allocation5 + $0x5d8] sm:$0xff]  ;;  %v878_v46 = vpack.c.bf16 %v244_v40, %v242_v38  ;;  %v752_v47 = vpack.c.bf16 %v121_v42, %v119_v41  ;;  %v118_v48 = vld [vmem:[#allocation5 + $0x1c0] sm:$0xff] }
  0x4f   :  { %v120_v49 = vld [vmem:[#allocation5 + $0x1d0] sm:$0xff]  ;;  %v246_v50 = vld [vmem:[#allocation5 + $0x5c0] sm:$0xff]  ;;  %v880_v51 = vpack.c.bf16 %v249_v44, %v247_v43  ;;  %v123_v53 = vld [vmem:[#allocation5 + $0x1e8] sm:$0xff] }
  0x50   :  { %735 = vmatpush1.bf16.msra.mxu1 %v734_v59  ;;  %v248_v52 = vld [vmem:[#allocation5 + $0x5d0] sm:$0xff]  ;;  %v125_v54 = vld [vmem:[#allocation5 + $0x1f8] sm:$0xff]  ;;  %v251_v55 = vld [vmem:[#allocation5 + $0x5e8] sm:$0xff]  ;;  %v754_v57 = vpack.c.bf16 %v120_v49, %v118_v48 }
  0x51   :  { %863 = vmatpush1.bf16.msra.mxu0 %v862_v60  ;;  %737 = vmatprep.subr.bf16.mxu1 %v736_v61  ;;  %v253_v56 = vld [vmem:[#allocation5 + $0x5f8] sm:$0xff]  ;;  %v882_v58 = vpack.c.bf16 %v248_v52, %v246_v50  ;;  %v756_v59 = vpack.c.bf16 %v125_v54, %v123_v53  ;;  %v122_v60 = vld [vmem:[#allocation5 + $0x1e0] sm:$0xff]  ;;  %v124_v61 = vld [vmem:[#allocation5 + $0x1f0] sm:$0xff] }
  0x52   :  { %865 = vmatprep.subr.bf16.mxu0 %v864_v1  ;;  %v250_v62 = vld [vmem:[#allocation5 + $0x5e0] sm:$0xff]  ;;  %v884_v63 = vpack.c.bf16 %v253_v56, %v251_v55  ;;  %v252_v0 = vld [vmem:[#allocation5 + $0x5f0] sm:$0xff]  ;;  %v127_v1 = vld [vmem:[#allocation5 + $0x208] sm:$0xff]  ;;  %v758_v5 = vpack.c.bf16 %v124_v61, %v122_v60 }
  0x53   :  { %v129_v2 = vld [vmem:[#allocation5 + $0x218] sm:$0xff]  ;;  %v255_v3 = vld [vmem:[#allocation5 + $0x608] sm:$0xff]  ;;  %v886_v6 = vpack.c.bf16 %v252_v0, %v250_v62  ;;  %v126_v8 = vld [vmem:[#allocation5 + $0x200] sm:$0xff] }
  0x54   :  { %739 = vmatpush1.bf16.msra.mxu1 %v738_v7  ;;  %v257_v4 = vld [vmem:[#allocation5 + $0x618] sm:$0xff]  ;;  %v760_v7 = vpack.c.bf16 %v129_v2, %v127_v1  ;;  %v256_v12 = vld [vmem:[#allocation5 + $0x610] sm:$0xff]  ;;  %v131_v13 = vld [vmem:[#allocation5 + $0x228] sm:$0xff] }
  0x55   :  { %867 = vmatpush1.bf16.msra.mxu0 %v866_v9  ;;  %741 = vmatprep.subr.bf16.mxu1 %v740_v10  ;;  %v128_v9 = vld [vmem:[#allocation5 + $0x210] sm:$0xff]  ;;  %v254_v10 = vld [vmem:[#allocation5 + $0x600] sm:$0xff]  ;;  %v888_v11 = vpack.c.bf16 %v257_v4, %v255_v3  ;;  %v259_v15 = vld [vmem:[#allocation5 + $0x628] sm:$0xff] }
  0x56   :  { %869 = vmatprep.subr.bf16.mxu0 %v868_v14  ;;  %v133_v14 = vld [vmem:[#allocation5 + $0x238] sm:$0xff]  ;;  %v46_v17 = vld [vmem:[#allocation2] sm:$0xff]  ;;  %v762_v18 = vpack.c.bf16 %v128_v9, %v126_v8  ;;  %v890_v20 = vpack.c.bf16 %v256_v12, %v254_v10  ;;  %v260_v26 = vld [vmem:[#allocation5 + $0x630] sm:$0xff] }
  0x57   :  { %v261_v16 = vld [vmem:[#allocation5 + $0x638] sm:$0xff]  ;;  %v50_v19 = vld [vmem:[#allocation2 + $0x20] sm:$0xff]  ;;  %v263_v29 = vld [vmem:[#allocation5 + $0x648] sm:$0xff] }
  0x58   :  { %743 = vmatpush1.bf16.msra.mxu1 %v742_v21  ;;  %v764_v21 = vpack.c.bf16 %v133_v14, %v131_v13  ;;  %v258_v24 = vld [vmem:[#allocation5 + $0x620] sm:$0xff]  ;;  %v892_v25 = vpack.c.bf16 %v261_v16, %v259_v15  ;;  %v137_v28 = vld [vmem:[#allocation5 + $0x258] sm:$0xff]  ;;  %v264_v38 = vld [vmem:[#allocation5 + $0x650] sm:$0xff] }
  0x59   :  { %871 = vmatpush1.bf16.msra.mxu0 %v870_v22  ;;  %745 = vmatprep.subr.bf16.mxu1 %v744_v23  ;;  %v130_v22 = vld [vmem:[#allocation5 + $0x220] sm:$0xff]  ;;  %v132_v23 = vld [vmem:[#allocation5 + $0x230] sm:$0xff]  ;;  %v265_v30 = vld [vmem:[#allocation5 + $0x658] sm:$0xff]  ;;  %v894_v32 = vpack.c.bf16 %v260_v26, %v258_v24 }
  0x5a   :  { %873 = vmatprep.subr.bf16.mxu0 %v872_v27  ;;  %v135_v27 = vld [vmem:[#allocation5 + $0x248] sm:$0xff]  ;;  %v766_v31 = vpack.c.bf16 %v132_v23, %v130_v22  ;;  %v262_v36 = vld [vmem:[#allocation5 + $0x640] sm:$0xff]  ;;  %v896_v37 = vpack.c.bf16 %v265_v30, %v263_v29  ;;  %v141_v40 = vld [vmem:[#allocation5 + $0x278] sm:$0xff] }
  0x5b   :  { %v267_v41 = vld [vmem:[#allocation5 + $0x668] sm:$0xff]  ;;  %v269_v42 = vld [vmem:[#allocation5 + $0x678] sm:$0xff]  ;;  %v898_v44 = vpack.c.bf16 %v264_v38, %v262_v36  ;;  %v266_v48 = vld [vmem:[#allocation5 + $0x660] sm:$0xff] }
  0x5c   :  { %747 = vmatpush1.bf16.msra.mxu1 %v746_v33  ;;  %v768_v33 = vpack.c.bf16 %v137_v28, %v135_v27  ;;  %v900_v49 = vpack.c.bf16 %v269_v42, %v267_v41  ;;  %v268_v50 = vld [vmem:[#allocation5 + $0x670] sm:$0xff]  ;;  %v145_v52 = vld [vmem:[#allocation5 + $0x298] sm:$0xff]  ;;  %v271_v53 = vld [vmem:[#allocation5 + $0x688] sm:$0xff] }
  0x5d   :  { %875 = vmatpush1.bf16.msra.mxu0 %v874_v34  ;;  %749 = vmatprep.subr.bf16.mxu1 %v748_v35  ;;  %v134_v34 = vld [vmem:[#allocation5 + $0x240] sm:$0xff]  ;;  %v136_v35 = vld [vmem:[#allocation5 + $0x250] sm:$0xff]  ;;  %v273_v54 = vld [vmem:[#allocation5 + $0x698] sm:$0xff]  ;;  %v902_v56 = vpack.c.bf16 %v268_v50, %v266_v48 }
  0x5e   :  { %877 = vmatprep.subr.bf16.mxu0 %v876_v39  ;;  %v139_v39 = vld [vmem:[#allocation5 + $0x268] sm:$0xff]  ;;  %v770_v43 = vpack.c.bf16 %v136_v35, %v134_v34  ;;  %v270_v60 = vld [vmem:[#allocation5 + $0x680] sm:$0xff]  ;;  %v904_v61 = vpack.c.bf16 %v273_v54, %v271_v53  ;;  %v272_v62 = vld [vmem:[#allocation5 + $0x690] sm:$0xff] }
  0x5f   :  { %v149_v0 = vld [vmem:[#allocation5 + $0x2b8] sm:$0xff]  ;;  %v275_v1 = vld [vmem:[#allocation5 + $0x6a8] sm:$0xff]  ;;  %v906_v4 = vpack.c.bf16 %v272_v62, %v270_v60  ;;  %v274_v8 = vld [vmem:[#allocation5 + $0x6a0] sm:$0xff] }
  0x60   :  { %751 = vmatpush1.bf16.msra.mxu1 %v750_v45  ;;  %v772_v45 = vpack.c.bf16 %v141_v40, %v139_v39  ;;  %v277_v2 = vld [vmem:[#allocation5 + $0x6b8] sm:$0xff]  ;;  %v276_v10 = vld [vmem:[#allocation5 + $0x6b0] sm:$0xff]  ;;  %v279_v13 = vld [vmem:[#allocation5 + $0x6c8] sm:$0xff] }
  0x61   :  { %879 = vmatpush1.bf16.msra.mxu0 %v878_v46  ;;  %753 = vmatprep.subr.bf16.mxu1 %v752_v47  ;;  %v138_v46 = vld [vmem:[#allocation5 + $0x260] sm:$0xff]  ;;  %v140_v47 = vld [vmem:[#allocation5 + $0x270] sm:$0xff]  ;;  %v908_v9 = vpack.c.bf16 %v277_v2, %v275_v1  ;;  %v153_v12 = vld [vmem:[#allocation5 + $0x2d8] sm:$0xff] }
  0x62   :  { %881 = vmatprep.subr.bf16.mxu0 %v880_v51  ;;  %v143_v51 = vld [vmem:[#allocation5 + $0x288] sm:$0xff]  ;;  %v774_v55 = vpack.c.bf16 %v140_v47, %v138_v46  ;;  %v281_v14 = vld [vmem:[#allocation5 + $0x6d8] sm:$0xff]  ;;  %v150_v15 = vld [vmem:[#allocation5 + $0x2c0] sm:$0xff] }
  0x63   :  { %v152_v22 = vld [vmem:[#allocation5 + $0x2d0] sm:$0xff]  ;;  %v278_v23 = vld [vmem:[#allocation5 + $0x6c0] sm:$0xff]  ;;  %v155_v27 = vld [vmem:[#allocation5 + $0x2e8] sm:$0xff] }
  0x64   :  { %755 = vmatpush1.bf16.msra.mxu1 %v754_v57  ;;  %v776_v57 = vpack.c.bf16 %v145_v52, %v143_v51  ;;  %v58_v24 = vld [vmem:[#allocation2 + $0x60] sm:$0xff]  ;;  %v280_v26 = vld [vmem:[#allocation5 + $0x6d0] sm:$0xff]  ;;  %v157_v28 = vld [vmem:[#allocation5 + $0x2f8] sm:$0xff] }
  0x65   :  { %883 = vmatpush1.bf16.msra.mxu0 %v882_v58  ;;  %757 = vmatprep.subr.bf16.mxu1 %v756_v59  ;;  %v142_v58 = vld [vmem:[#allocation5 + $0x280] sm:$0xff]  ;;  %v144_v59 = vld [vmem:[#allocation5 + $0x290] sm:$0xff]  ;;  %v283_v29 = vld [vmem:[#allocation5 + $0x6e8] sm:$0xff]  ;;  %v914_v35 = vpack.c.bf16 %v280_v26, %v278_v23  ;;  %v788_v36 = vpack.c.bf16 %v157_v28, %v155_v27 }
  0x66   :  { %885 = vmatprep.subr.bf16.mxu0 %v884_v63  ;;  %v147_v63 = vld [vmem:[#allocation5 + $0x2a8] sm:$0xff]  ;;  %v778_v3 = vpack.c.bf16 %v144_v59, %v142_v58  ;;  %v285_v30 = vld [vmem:[#allocation5 + $0x6f8] sm:$0xff]  ;;  %v282_v38 = vld [vmem:[#allocation5 + $0x6e0] sm:$0xff] }
  0x67   :  { %v53_v34 = vld [vmem:[#allocation2 + $0x38] sm:$0xff]  ;;  %v284_v39 = vld [vmem:[#allocation5 + $0x6f0] sm:$0xff]  ;;  %v916_v40 = vpack.c.bf16 %v285_v30, %v283_v29  ;;  %v159_v41 = vld [vmem:[#allocation5 + $0x308] sm:$0xff] }
  0x68   :  { %759 = vmatpush1.bf16.msra.mxu1 %v758_v5  ;;  %v780_v5 = vpack.c.bf16 %v149_v0, %v147_v63  ;;  %v161_v42 = vld [vmem:[#allocation5 + $0x318] sm:$0xff]  ;;  %v639_v47 = vld [vmem:[%s1142_s1 + $0x8] sm:$0xff]  ;;  %v918_v48 = vpack.c.bf16 %v284_v39, %v282_v38  ;;  %v158_v50 = vld [vmem:[#allocation5 + $0x300] sm:$0xff] }
  0x69   :  { %887 = vmatpush1.bf16.msra.mxu0 %v886_v6  ;;  %761 = vmatprep.subr.bf16.mxu1 %v760_v7  ;;  %v146_v6 = vld [vmem:[#allocation5 + $0x2a0] sm:$0xff]  ;;  %v148_v7 = vld [vmem:[#allocation5 + $0x2b0] sm:$0xff]  ;;  %v293_v58 = vld [vmem:[#allocation5 + $0x738] sm:$0xff] }
  0x6a   :  { %889 = vmatprep.subr.bf16.mxu0 %v888_v11  ;;  %v151_v11 = vld [vmem:[#allocation5 + $0x2c8] sm:$0xff]  ;;  %v782_v16 = vpack.c.bf16 %v148_v7, %v146_v6  ;;  %v160_v51 = vld [vmem:[#allocation5 + $0x310] sm:$0xff]  ;;  %v286_v52 = vld [vmem:[#allocation5 + $0x700] sm:$0xff] }
  0x6b   :  { %395 = vmatmul.mubr.f32.vlgmr.msra.gmra.mrb[0].mxu1 %v46_v17  ;;  %v55_v17 = vld [vmem:[#allocation2 + $0x48] sm:$0xff]  ;;  %v288_v54 = vld [vmem:[#allocation5 + $0x710] sm:$0xff]  ;;  %v794_v59 = vpack.c.bf16 %v160_v51, %v158_v50  ;;  %v162_v62 = vld [vmem:[#allocation5 + $0x320] sm:$0xff] }
  0x6c   :  { %763 = vmatpush1.bf16.msra.mxu1 %v762_v18  ;;  %549 = vmatmul.mubr.f32.vlgmr.msra.gmra.mrb[0].mxu0 %v50_v19  ;;  %v59_v18 = vld [vmem:[#allocation2 + $0x68] sm:$0xff]  ;;  %v54_v19 = vld [vmem:[#allocation2 + $0x40] sm:$0xff]  ;;  %v922_v60 = vpack.c.bf16 %v288_v54, %v286_v52  ;;  %v164_v63 = vld [vmem:[#allocation5 + $0x330] sm:$0xff] }
  0x6d   :  { %891 = vmatpush1.bf16.msra.mxu0 %v890_v20  ;;  %765 = vmatprep.subr.bf16.mxu1 %v764_v21  ;;  %v910_v20 = vpack.c.bf16 %v276_v10, %v274_v8  ;;  %v784_v21 = vpack.c.bf16 %v153_v12, %v151_v11  ;;  %v290_v0 = vld [vmem:[#allocation5 + $0x720] sm:$0xff]  ;;  %v292_v2 = vld [vmem:[#allocation5 + $0x730] sm:$0xff]  ;;  %v297_v6 = vld [vmem:[#allocation5 + $0x758] sm:$0xff]  ;;  %v798_v7 = vpack.c.bf16 %v164_v63, %v162_v62 }
  0x6e   :  { %893 = vmatprep.subr.bf16.mxu0 %v892_v25  ;;  %v912_v25 = vpack.c.bf16 %v281_v14, %v279_v13  ;;  %400 = vmatprep.mubr.f32.mxu1 %v55_v17  ;;  %v926_v8 = vpack.c.bf16 %v292_v2, %v290_v0  ;;  %v166_v10 = vld [vmem:[#allocation5 + $0x340] sm:$0xff]  ;;  %v168_v11 = vld [vmem:[#allocation5 + $0x350] sm:$0xff]  ;;  %v299_v17 = vld [vmem:[#allocation5 + $0x768] sm:$0xff] }
  0x6f   :  { %554 = vmatprep.mubr.f32.mxu0 %v59_v18  ;;  %401 = vmatmul.mubr.f32.gmra.mrb[2].mxu1 %v54_v19  ;;  %v294_v12 = vld [vmem:[#allocation5 + $0x740] sm:$0xff]  ;;  %v296_v14 = vld [vmem:[#allocation5 + $0x750] sm:$0xff]  ;;  %v301_v18 = vld [vmem:[#allocation5 + $0x778] sm:$0xff]  ;;  %v802_v19 = vpack.c.bf16 %v168_v11, %v166_v10 }
  0x70   :  { %767 = vmatpush1.bf16.msra.mxu1 %v766_v31  ;;  %v786_v31 = vpack.c.bf16 %v152_v22, %v150_v15  ;;  %555 = vmatmul.mubr.f32.gmra.mrb[2].mxu0 %v58_v24  ;;  %v171_v15 = vld [vmem:[#allocation5 + $0x368] sm:$0xff]  ;;  %v170_v22 = vld [vmem:[#allocation5 + $0x360] sm:$0xff]  ;;  %v172_v23 = vld [vmem:[#allocation5 + $0x370] sm:$0xff] }
  0x71   :  { %895 = vmatpush1.bf16.msra.mxu0 %v894_v32  ;;  %769 = vmatprep.subr.bf16.mxu1 %v768_v33  ;;  %v154_v32 = vld [vmem:[#allocation5 + $0x2e0] sm:$0xff]  ;;  %v49_v33 = vld [vmem:[#allocation2 + $0x18] sm:$0xff]  ;;  %v300_v26 = vld [vmem:[#allocation5 + $0x770] sm:$0xff] }
  0x72   :  { %897 = vmatprep.subr.bf16.mxu0 %v896_v37  ;;  %v156_v37 = vld [vmem:[#allocation5 + $0x2f0] sm:$0xff]  ;;  %471 = vmatprep.mubr.f32.mxu1 %v49_v33  ;;  %v298_v24 = vld [vmem:[#allocation5 + $0x760] sm:$0xff]  ;;  %v175_v27 = vld [vmem:[#allocation5 + $0x388] sm:$0xff] }
  0x73   :  { %625 = vmatprep.mubr.f32.mxu0 %v53_v34  ;;  %v790_v46 = vpack.c.bf16 %v156_v37, %v154_v32  ;;  %v177_v28 = vld [vmem:[#allocation5 + $0x398] sm:$0xff]  ;;  %v303_v29 = vld [vmem:[#allocation5 + $0x788] sm:$0xff]  ;;  %v934_v32 = vpack.c.bf16 %v300_v26, %v298_v24  ;;  %v174_v34 = vld [vmem:[#allocation5 + $0x380] sm:$0xff] }
  0x74   :  { %771 = vmatpush1.bf16.msra.mxu1 %v770_v43  ;;  %v638_v43 = vld [vmem:[%s1142_s1] sm:$0xff]  ;;  %v305_v30 = vld [vmem:[#allocation5 + $0x798] sm:$0xff]  ;;  %v808_v33 = vpack.c.bf16 %v177_v28, %v175_v27  ;;  %v304_v38 = vld [vmem:[#allocation5 + $0x790] sm:$0xff] }
  0x75   :  { %899 = vmatpush1.bf16.msra.mxu0 %v898_v44  ;;  %773 = vmatprep.subr.bf16.mxu1 %v772_v45  ;;  %v287_v44 = vld [vmem:[#allocation5 + $0x708] sm:$0xff]  ;;  %v289_v45 = vld [vmem:[#allocation5 + $0x718] sm:$0xff]  ;;  %v936_v37 = vpack.c.bf16 %v305_v30, %v303_v29  ;;  %v308_v50 = vld [vmem:[#allocation5 + $0x7b0] sm:$0xff] }
  0x76   :  { %901 = vmatprep.subr.bf16.mxu0 %v900_v49  ;;  %642 = vperm.xlu0 %976, %v638_v43   ;;  %v792_v49 = vpack.c.bf16 %v161_v42, %v159_v41  ;;  %v920_v53 = vpack.c.bf16 %v289_v45, %v287_v44  ;;  %v179_v39 = vld [vmem:[#allocation5 + $0x3a8] sm:$0xff]  ;;  %v309_v42 = vld [vmem:[#allocation5 + $0x7b8] sm:$0xff]  ;;  %v312_v62 = vld [vmem:[#allocation5 + $0x7d0] sm:$0xff] }
  0x77   :  { %v307_v41 = vld [vmem:[#allocation5 + $0x7a8] sm:$0xff]  ;;  %v185_v52 = vld [vmem:[#allocation5 + $0x3d8] sm:$0xff]  ;;  %v316_v10 = vld [vmem:[#allocation5 + $0x7f0] sm:$0xff] }
  0x78   :  { %775 = vmatpush1.bf16.msra.mxu1 %v774_v55  ;;  %v163_v55 = vld [vmem:[#allocation5 + $0x328] sm:$0xff]  ;;  %v313_v54 = vld [vmem:[#allocation5 + $0x7d8] sm:$0xff] }
  0x79   :  { %903 = vmatpush1.bf16.msra.mxu0 %v902_v56  ;;  %777 = vmatprep.subr.bf16.mxu1 %v776_v57  ;;  %v165_v56 = vld [vmem:[#allocation5 + $0x338] sm:$0xff]  ;;  %v291_v57 = vld [vmem:[#allocation5 + $0x728] sm:$0xff] }
  0x7a   :  { %905 = vmatprep.subr.bf16.mxu0 %v904_v61  ;;  %647 = vperm.xlu0 %976, %v639_v47   ;;  %v796_v61 = vpack.c.bf16 %v165_v56, %v163_v55  ;;  %v924_v1 = vpack.c.bf16 %v293_v58, %v291_v57  ;;  %v180_v47 = vld [vmem:[#allocation5 + $0x3b0] sm:$0xff]  ;;  %v183_v51 = vld [vmem:[#allocation5 + $0x3c8] sm:$0xff]  ;;  %v182_v58 = vld [vmem:[#allocation5 + $0x3c0] sm:$0xff] }
  0x7b   :  { %v816_v57 = vpack.c.bf16 %v185_v52, %v183_v51  ;;  %v187_v63 = vld [vmem:[#allocation5 + $0x3e8] sm:$0xff]  ;;  %v189_v0 = vld [vmem:[#allocation5 + $0x3f8] sm:$0xff] }
  0x7c   :  { %779 = vmatpush1.bf16.msra.mxu1 %v778_v3  ;;  %v167_v3 = vld [vmem:[#allocation5 + $0x348] sm:$0xff]  ;;  %v317_v2 = vld [vmem:[#allocation5 + $0x7f8] sm:$0xff] }
  0x7d   :  { %907 = vmatpush1.bf16.msra.mxu0 %v906_v4  ;;  %781 = vmatprep.subr.bf16.mxu1 %v780_v5  ;;  %v169_v4 = vld [vmem:[#allocation5 + $0x358] sm:$0xff]  ;;  %v295_v5 = vld [vmem:[#allocation5 + $0x748] sm:$0xff] }
  0x7e   :  { %909 = vmatprep.subr.bf16.mxu0 %v908_v9  ;;  %v800_v9 = vpack.c.bf16 %v169_v4, %v167_v3  ;;  %v928_v13 = vpack.c.bf16 %v297_v6, %v295_v5  ;;  %v820_v5 = vpack.c.bf16 %v189_v0, %v187_v63  ;;  %v186_v6 = vld [vmem:[#allocation5 + $0x3e0] sm:$0xff] }
  0x80   :  { %783 = vmatpush1.bf16.msra.mxu1 %v782_v16  ;;  %v173_v16 = vld [vmem:[#allocation5 + $0x378] sm:$0xff] }
  0x81   :  { %911 = vmatpush1.bf16.msra.mxu0 %v910_v20  ;;  %785 = vmatprep.subr.bf16.mxu1 %v784_v21  ;;  %v930_v20 = vpack.c.bf16 %v296_v14, %v294_v12  ;;  %v804_v21 = vpack.c.bf16 %v173_v16, %v171_v15  ;;  %v52_v14 = vld [vmem:[#allocation2 + $0x30] sm:$0xff]  ;;  %v57_v15 = vld [vmem:[#allocation2 + $0x58] sm:$0xff] }
  0x82   :  { %913 = vmatprep.subr.bf16.mxu0 %v912_v25  ;;  %v932_v25 = vpack.c.bf16 %v301_v18, %v299_v17  ;;  %v61_v16 = vld [vmem:[#allocation2 + $0x78] sm:$0xff]  ;;  %v56_v17 = vld [vmem:[#allocation2 + $0x50] sm:$0xff] }
  0x83   :  { %v60_v18 = vld [vmem:[#allocation2 + $0x70] sm:$0xff] }
  0x84   :  { %787 = vmatpush1.bf16.msra.mxu1 %v786_v31  ;;  %v806_v31 = vpack.c.bf16 %v172_v23, %v170_v22  ;;  %v318_v22 = vld [vmem:[%s1144_s3] sm:$0x3]  ;;  %s1064_s3 = smov [#allocation7]  }
  0x85   :  { %915 = vmatpush1.bf16.msra.mxu0 %v914_v35  ;;  %789 = vmatprep.subr.bf16.mxu1 %v788_v36  ;;  %v176_v35 = vld [vmem:[#allocation5 + $0x390] sm:$0xff]  ;;  %v302_v36 = vld [vmem:[#allocation5 + $0x780] sm:$0xff]  ;;  %s683_s20 = sshll.u32 %s1064_s3, 4  ;;  %s684_s20 = int_to_ptr.vmem [resolvable:$true] %s683_s20 }
  0x86   :  { %917 = vmatprep.subr.bf16.mxu0 %v916_v40  ;;  %v181_v40 = vld [vmem:[#allocation5 + $0x3b8] sm:$0xff]  ;;  %v810_v43 = vpack.c.bf16 %v176_v35, %v174_v34  ;;  %v938_v44 = vpack.c.bf16 %v304_v38, %v302_v36  ;;  %s1029_s21 = scalar_lea.vmem %s684_s20, 512  ;;  %p1034_p3 = scmp.lt.s32.totalorder %s684_s20, %s684_s20 }
  0x87   :  { %v812_v45 = vpack.c.bf16 %v181_v40, %v179_v39  ;;  %p1030_p2 = scmp.ne.s32.totalorder %s684_s20, %s1029_s21  ;;  %p1035_p4 = scmp.lt.s32.totalorder %s1029_s21, %s1029_s21 }
  0x88   :  { %791 = vmatpush1.bf16.msra.mxu1 %v790_v46  ;;  %v178_v46 = vld [vmem:[#allocation5 + $0x3a0] sm:$0xff] }
  0x89   :  { %919 = vmatpush1.bf16.msra.mxu0 %v918_v48  ;;  %793 = vmatprep.subr.bf16.mxu1 %v792_v49  ;;  %v306_v48 = vld [vmem:[#allocation5 + $0x7a0] sm:$0xff]  ;;  %v940_v49 = vpack.c.bf16 %v309_v42, %v307_v41  ;;  %v814_v55 = vpack.c.bf16 %v180_v47, %v178_v46  ;;  %p1036_p5 = por %p1035_p4, %p1034_p3 }
  0x8a   :  { %921 = vmatprep.subr.bf16.mxu0 %v920_v53  ;;  %v311_v53 = vld [vmem:[#allocation5 + $0x7c8] sm:$0xff]  ;;  %v942_v56 = vpack.c.bf16 %v308_v50, %v306_v48 }
  0x8b   :  { %p1037_p6 = pnand %p1036_p5, %p1030_p2 }
  0x8c   :  { %795 = vmatpush1.bf16.msra.mxu1 %v794_v59  ;;  %v184_v59 = vld [vmem:[#allocation5 + $0x3d0] sm:$0xff] }
  0x8d   :  { %923 = vmatpush1.bf16.msra.mxu0 %v922_v60  ;;  %797 = vmatprep.subr.bf16.mxu1 %v796_v61  ;;  %v310_v60 = vld [vmem:[#allocation5 + $0x7c0] sm:$0xff]  ;;  %v944_v61 = vpack.c.bf16 %v313_v54, %v311_v53  ;;  %v818_v3 = vpack.c.bf16 %v184_v59, %v182_v58 }
  0x8e   :  { %925 = vmatprep.subr.bf16.mxu0 %v924_v1  ;;  %v315_v1 = vld [vmem:[#allocation5 + $0x7e8] sm:$0xff]  ;;  %v946_v4 = vpack.c.bf16 %v312_v62, %v310_v60 }
  0x90   :  { %799 = vmatpush1.bf16.msra.mxu1 %v798_v7  ;;  %v188_v7 = vld [vmem:[#allocation5 + $0x3f0] sm:$0xff] }
  0x91   :  { %927 = vmatpush1.bf16.msra.mxu0 %v926_v8  ;;  %801 = vmatprep.subr.bf16.mxu1 %v800_v9  ;;  %v948_v8 = vpack.c.bf16 %v317_v2, %v315_v1  ;;  %v314_v9 = vld [vmem:[#allocation5 + $0x7e0] sm:$0xff]  ;;  %v822_v11 = vpack.c.bf16 %v188_v7, %v186_v6 }
  0x92   :  { %929 = vmatprep.subr.bf16.mxu0 %v928_v13  ;;  %v950_v12 = vpack.c.bf16 %v316_v10, %v314_v9  ;;  %v48_v13 = vld [vmem:[#allocation2 + $0x10] sm:$0xff] }
  0x94   :  { %803 = vmatpush1.bf16.msra.mxu1 %v802_v19  ;;  %v320_v19 = vlaneseq }
  0x95   :  { %931 = vmatpush1.bf16.msra.mxu0 %v930_v20  ;;  %805 = vmatprep.subr.bf16.mxu1 %v804_v21 }
  0x96   :  { %933 = vmatprep.subr.bf16.mxu0 %v932_v25  ;;  %v321_v20 = vshrl.u32 %v320_v19, 7 }
  0x98   :  { %807 = vmatpush1.bf16.msra.mxu1 %v806_v31  ;;  %v322_v21 = vsub.s32 0, %v321_v20  ;;  %v326_v23 = vsub.s32 1, %v321_v20 }
  0x99   :  { %935 = vmatpush1.bf16.msra.mxu0 %v934_v32  ;;  %809 = vmatprep.subr.bf16.mxu1 %v808_v33 }
  0x9a   :  { %937 = vmatprep.subr.bf16.mxu0 %v936_v37  ;;  %v323_v24 = vrot.slane %v318_v22, %v322_v21  ;;  %v327_v25 = vrot.slane %v318_v22, %v326_v23 }
  0x9c   :  { %811 = vmatpush1.bf16.msra.mxu1 %v810_v43 }
  0x9d   :  { %939 = vmatpush1.bf16.msra.mxu0 %v938_v44  ;;  %813 = vmatprep.subr.bf16.mxu1 %v812_v45 }
  0x9e   :  { %941 = vmatprep.subr.bf16.mxu0 %v940_v49 }
  0xa0   :  { %815 = vmatpush1.bf16.msra.mxu1 %v814_v55 }
  0xa1   :  { %943 = vmatpush1.bf16.msra.mxu0 %v942_v56  ;;  %817 = vmatprep.subr.bf16.mxu1 %v816_v57 }
  0xa2   :  { %945 = vmatprep.subr.bf16.mxu0 %v944_v61 }
  0xa4   :  { %819 = vmatpush1.bf16.msra.mxu1 %v818_v3 }
  0xa5   :  { %947 = vmatpush1.bf16.msra.mxu0 %v946_v4  ;;  %821 = vmatprep.subr.bf16.mxu1 %v820_v5 }
  0xa6   :  { %949 = vmatprep.subr.bf16.mxu0 %v948_v8 }
  0xa8   :  { %823 = vmatpush1.bf16.msra.mxu1 %v822_v11 }
  0xa9   :  { %951 = vmatpush1.bf16.msra.mxu0 %v950_v12 }
  0xab   :  { %472 = vmatmul.mubr.f32.vlgmr.msra.gmra.mrb[0].mxu1 %v48_v13 }
  0xac   :  { %626 = vmatmul.mubr.f32.vlgmr.msra.gmra.mrb[0].mxu0 %v52_v14  ;;  %477 = vmatprep.mubr.f32.mxu1 %v57_v15 }
  0xad   :  { %631 = vmatprep.mubr.f32.mxu0 %v61_v16 }
  0xaf   :  { %478 = vmatmul.mubr.f32.gmra.mrb[2].mxu1 %v56_v17 }
  0xb0   :  { %632 = vmatmul.mubr.f32.gmra.mrb[2].mxu0 %v60_v18 }
  0xf5   :  { %v643_v30 = vpop.permute.xlu0 %642 }
  0xf9   :  { %v648_v46 = vpop.permute.xlu0 %647 }
 0x17e   :  { %v473_v26 = vpop.f32.mrb[0].mxu1 }
 0x17f   :  { %v952_v27 = vadd.f32 %v473_v26, %v323_v24  ;;  %v627_v28 = vpop.f32.mrb[0].mxu0  ;;  %v475_v29 = vpop.f32.mrb[1].mxu1 }
 0x180   :  { %v954_v31 = vadd.f32 %v475_v29, %v327_v25  ;;  %v629_v32 = vpop.f32.mrb[1].mxu0 }
 0x181   :  { %v953_v33 = vadd.f32 %v952_v27, %v627_v28 }
 0x182   :  { %v955_v34 = vadd.f32 %v954_v31, %v629_v32  ;;  %v479_v35 = vpop.f32.mrb[2].mxu1 }
 0x183   :  { %v650_v36 = vmul.f32 %v953_v33, %v643_v30  ;;  %v956_v37 = vadd.f32 %v479_v35, %v323_v24  ;;  %v633_v38 = vpop.f32.mrb[2].mxu0  ;;  %v481_v39 = vpop.f32.mrb[3].mxu1 }
 0x184   :  { %v651_v40 = vmul.f32 %v955_v34, %v643_v30  ;;  %v958_v41 = vadd.f32 %v481_v39, %v327_v25  ;;  %v635_v42 = vpop.f32.mrb[3].mxu0 }
 0x185   :  { %v658_v43 = vmul.f32 0.70710677, %v650_v36  ;;  %v957_v44 = vadd.f32 %v956_v37, %v633_v38  ;;  %v654_v54 = vmul.f32 0.5, %v650_v36 }
 0x186   :  { %v659_v45 = vmul.f32 0.70710677, %v651_v40  ;;  %v959_v47 = vadd.f32 %v958_v41, %v635_v42  ;;  %v655_v56 = vmul.f32 0.5, %v651_v40 }
 0x187   :  { %977 = verf.f32 %v658_v43  ;;  %v652_v48 = vmul.f32 %v957_v44, %v648_v46 }
 0x188   :  { %979 = verf.f32 %v659_v45  ;;  %v653_v49 = vmul.f32 %v959_v47, %v648_v46 }
 0x189   :  { %v660_v50 = vmul.f32 0.70710677, %v652_v48  ;;  %v656_v62 = vmul.f32 0.5, %v652_v48 }
 0x18a   :  { %v661_v51 = vmul.f32 0.70710677, %v653_v49  ;;  %v657_v0 = vmul.f32 0.5, %v653_v49 }
 0x18b   :  { %981 = verf.f32 %v660_v50 }
 0x18c   :  { %983 = verf.f32 %v661_v51 }
 0x191   :  { %v978_v52 = vpop.eup %977 }
 0x192   :  { %v980_v53 = vpop.eup %979  ;;  %v666_v55 = vadd.f32 1.0, %v978_v52 }
 0x193   :  { %v667_v57 = vadd.f32 1.0, %v980_v53 }
 0x194   :  { %v670_v58 = vmul.f32 %v666_v55, %v654_v54 }
 0x195   :  { %v982_v59 = vpop.eup %981  ;;  %v671_v60 = vmul.f32 %v667_v57, %v655_v56 }
 0x196   :  { %v984_v61 = vpop.eup %983  ;;  %674 = vst [vmem:[#allocation7] sm:$0xff] %v670_v58  ;;  %v668_v63 = vadd.f32 1.0, %v982_v59 }
 0x197   :  { %675 = vst [vmem:[#allocation7 + $0x8] sm:$0xff] %v671_v60  ;;  %v669_v1 = vadd.f32 1.0, %v984_v61 }
 0x198   :  { %v672_v2 = vmul.f32 %v668_v63, %v656_v62 }
 0x199   :  { %v673_v3 = vmul.f32 %v669_v1, %v657_v0 }
 0x19a   :  { %676 = vst [vmem:[#allocation7 + $0x10] sm:$0xff] %v672_v2 }
 0x19b   :  { %677 = vst [vmem:[#allocation7 + $0x18] sm:$0xff] %v673_v3 }
 0x19c   :  { %1040 = shalt.err (!%p1037_p6)
}
 0x19d   :  { %s1041_s24 = scalar_lea.hbm %s1145_s4, 512 }
 0x19e   :  { %p1042_p7 = scmp.ne.s32.totalorder %s1145_s4, %s1041_s24  ;;  %p1045_p8 = scmp.lt.u32.totalorder %s1041_s24, %s1145_s4 }
 0x1a0   :  { %p1047_p9 = pnand %p1045_p8, %p1042_p7 }
 0x1a2   :  { %1050 = shalt.err (!%p1047_p9)
}
 0x1a3   :  { %689 = dma.vmem_to_hbm [thread:$0]  %s684_s20, 512, %s1145_s4, [#allocation4], %s1061_s0, %s1061_s0, %s1062_s13  }
 0x1a4   :  { %1055 = dma.done.wait [#allocation4], 512  }
 0x1a5   :  { %1056 = vsyncadd [#allocation4], 4294966784 }
 0x1a6   :  { %693 = vsyncpa [#allocation3], 1 }
 0x1a7   :  { %694 = vsyncpa [#allocation6], 1 }
 0x1a8   :  { %695 = vsyncpa [#allocation4], 1 }

</bundles_post_ra>
